<compile_context>
chip_gen: v6e
topology: v6e:2x2x1
jax: 0.10.0
libtpu: 0.0.40
codegen_flags: <defaults>
</compile_context>

<pallas_src>
import functools

import jax
import jax.numpy as jnp
from jax import lax
from jax.experimental import pallas as pl
from jax.experimental.pallas import tpu as pltpu

LANE = 128       # lane width: hidden (3N) padded to this for dense vregs
_TM_CAP = 1024   # max batch rows per tile (footprint at D=32 is a few hundred KiB)


def _ensemble_kernel(x_ref, wcat_ref, bcat_ref, wreg_ref, breg_ref, o_ref, *,
                     matmul_dtype):
    # x_ref:    (TM, D)    f32 (cast to matmul_dtype in-kernel; hides under MXU)
    # wcat_ref: (HP, D)    matmul_dtype  -- zero-padded row-stack of member weights
    # bcat_ref: (1, HP)    f32           -- zero-padded concat bias
    # wreg_ref: (OP8, HP)  f32           -- zero-padded regressor weight
    # breg_ref: (OP8, 1)   f32           -- zero-padded regressor bias (column)
    # o_ref:    (OP8, TM)  f32           -- TRANSPOSED output (batch on lane axis)
    x = x_ref[...].astype(matmul_dtype)
    # tmp = x @ Wcat^T  (contract last dims; native MXU orientation), f32 accumulate.
    tmp = lax.dot_general(
        x, wcat_ref[...], (((1,), (1,)), ((), ())),
        preferred_element_type=jnp.float32,
    )  # (TM, HP) f32
    # Bias add + ReLU in f32 on the VPU (v5e has no bf16 VPU path).
    tmp = jnp.maximum(tmp + bcat_ref[...], 0.0)
    # Transposed second matmul: out^T = Wreg @ tmp^T -> (OP8, TM). Keeping tmp in
    # f32 (K = HP is tiny) avoids the extra bf16 downcast; writeback is only
    # OP8 * 4 bytes per batch row instead of a 128-lane padded f32 row.
    out_t = lax.dot_general(
        wreg_ref[...], tmp, (((1,), (1,)), ((), ())),
        preferred_element_type=jnp.float32,
    )  # (OP8, TM) f32
    o_ref[...] = out_t + breg_ref[...]


def _round_up(v, m):
    return ((v + m - 1) // m) * m


def _pick_tm(B):
    """Return (batch tile, padded batch).

    - B <= 256: a single tile covering the (sublane-padded) batch — block dims
      equal the full array dims, so no lane-multiple constraint on tm.
    - Larger B: tm is a multiple of 128 (full-lane stores of the (OP8, tm)
      transposed output block) chosen so the grid has >= 2 tiles, letting
      dimension_semantics=("parallel",) feed both v7x TensorCores, capped at
      _TM_CAP to keep per-step overhead amortized without VMEM risk.
    """
    if B <= 256:
        bp = _round_up(B, 8)
        return bp, bp
    half_lane_tiles = pl.cdiv(B, 2 * LANE)
    tm = min(_TM_CAP, LANE * half_lane_tiles)
    bp = pl.cdiv(B, tm) * tm
    return tm, bp


def _xla_fallback(x, member_w, member_b, reg_w, reg_b):
    # Small-batch path: let XLA fuse the two GEMMs + ReLU (pallas_call fixed
    # overhead + pad/slice plumbing dominate below a few hundred rows).
    N, three, D = member_w.shape
    wcat = member_w.reshape(N * three, D)
    bcat = member_b.reshape(N * three)
    tmp = jnp.maximum(x @ wcat.T + bcat, 0.0)
    return tmp @ reg_w.T + reg_b


@functools.partial(jax.jit, static_argnames=("matmul_dtype", "min_pallas_batch"))
def my_linear_ensemble(x, member_w, member_b, reg_w, reg_b,
                       matmul_dtype=jnp.bfloat16, min_pallas_batch=512):
    """x: (B, D); member_w: (N, 3, D); member_b: (N, 3); reg_w: (OUT, 3N); reg_b: (OUT,)."""
    B, D = x.shape
    N, three, _ = member_w.shape
    hidden = N * three
    out_dim = reg_w.shape[0]

    if B < min_pallas_batch:
        return _xla_fallback(x, member_w, member_b, reg_w, reg_b)

    hp = _round_up(hidden, LANE)   # padded hidden (lane-dense intermediate)
    op8 = _round_up(out_dim, 8)    # output rows padded to a sublane multiple only

    # --- parameter packing (zero-padding keeps the math exact: relu(0)=0 and the
    # padded regressor rows/cols are zero). In production, hoist this out of the
    # per-call jit when weights are reused across calls. ------------------------
    wcat = member_w.reshape(hidden, D)
    wcat = jnp.pad(wcat, ((0, hp - hidden), (0, 0))).astype(matmul_dtype)
    bcat = jnp.pad(member_b.reshape(1, hidden),
                   ((0, 0), (0, hp - hidden))).astype(jnp.float32)
    wreg = jnp.pad(reg_w, ((0, op8 - out_dim), (0, hp - hidden))).astype(jnp.float32)
    breg = jnp.pad(reg_b.reshape(out_dim, 1),
                   ((0, op8 - out_dim), (0, 0))).astype(jnp.float32)

    # --- batch tiling -----------------------------------------------------------
    tm, bp = _pick_tm(B)
    x_p = x if bp == B else jnp.pad(x, ((0, bp - B), (0, 0)))
    # x stays in its input dtype (f32): single HBM read, cast to bf16 in-kernel.

    n_tiles = bp // tm
    wbytes = jnp.dtype(matmul_dtype).itemsize
    xbytes = jnp.dtype(x.dtype).itemsize
    # Real (unpadded) traffic / flops for XLA's scheduler.
    cost = pl.CostEstimate(
        flops=2 * B * D * hidden + 2 * B * hidden * out_dim,
        transcendentals=0,
        bytes_accessed=(B * D * xbytes            # x
                        + hidden * D * wbytes     # wcat
                        + out_dim * hidden * 4    # wreg (f32)
                        + (hidden + out_dim) * 4  # biases
                        + B * out_dim * 4),       # out (f32)
    )
    # VMEM footprint: double-buffered x / out blocks + resident padded weights.
    vmem_bytes = (2 * tm * D * 4 + 2 * op8 * tm * 4
                  + 2 * hp * D * wbytes + 2 * op8 * hp * 4
                  + 2 * (hp + op8) * 4)
    vmem_limit = int(min(96 * 2**20, max(4 * vmem_bytes, 16 * 2**20)))

    kernel = functools.partial(_ensemble_kernel, matmul_dtype=matmul_dtype)
    out_t = pl.pallas_call(
        kernel,
        out_shape=jax.ShapeDtypeStruct((op8, bp), jnp.float32),
        grid=(n_tiles,),
        in_specs=[
            pl.BlockSpec((tm, D), lambda i: (i, 0)),      # x: tiled over batch
            pl.BlockSpec((hp, D), lambda i: (0, 0)),      # weights resident across grid
            pl.BlockSpec((1, hp), lambda i: (0, 0)),
            pl.BlockSpec((op8, hp), lambda i: (0, 0)),
            pl.BlockSpec((op8, 1), lambda i: (0, 0)),
        ],
        out_specs=pl.BlockSpec((op8, tm), lambda i: (0, i)),  # transposed output slab
        compiler_params=pltpu.CompilerParams(
            dimension_semantics=("parallel",),            # batch axis: megacore-shardable
            vmem_limit_bytes=vmem_limit,
        ),
        cost_estimate=cost,
    )(x_p, wcat, bcat, wreg, breg)

    # (OP8, bp) transposed slab -> (B, OUT); transposing OUT x B values is negligible.
    return out_t[:out_dim, :B].T


def _reference(x, member_w, member_b, reg_w, reg_b):
    # Plain-JAX (f32) reference of the PyTorch forward.
    outs = [x @ member_w[i].T + member_b[i] for i in range(member_w.shape[0])]
    tmp = jnp.concatenate(outs, axis=1)
    tmp = jnp.maximum(tmp, 0.0)
    return tmp @ reg_w.T + reg_b


if __name__ == "__main__":
    D = 32                # input features
    N_MODELS = 4          # len(model_list); each member is a Linear(D, 3)
    OUT = 3               # outshape

    key = jax.random.PRNGKey(0)
    k_x, k_mw, k_mb, k_rw, k_rb, k_x2 = jax.random.split(key, 6)

    member_w = jax.random.normal(k_mw, (N_MODELS, 3, D), dtype=jnp.float32) * 0.1
    member_b = jax.random.normal(k_mb, (N_MODELS, 3), dtype=jnp.float32) * 0.1
    reg_w = jax.random.normal(k_rw, (OUT, 3 * N_MODELS), dtype=jnp.float32) * 0.1
    reg_b = jax.random.normal(k_rb, (OUT,), dtype=jnp.float32) * 0.1

    # --- small shape (B=8): force the Pallas path (single-tile grid) -------------
    B = 8
    x = jax.random.normal(k_x, (B, D), dtype=jnp.float32)
    ref = _reference(x, member_w, member_b, reg_w, reg_b)

    out = jax.block_until_ready(
        my_linear_ensemble(x, member_w, member_b, reg_w, reg_b,
                           min_pallas_batch=0))
    assert out.shape == (B, OUT)
    # bf16 MXU operands on the first matmul -> relaxed tolerance vs f32 reference.
    assert jnp.allclose(out, ref, atol=2e-2, rtol=2e-2), (
        f"max abs err {jnp.max(jnp.abs(out - ref))}")

    # Pure-f32 path must match tightly.
    out_f32 = jax.block_until_ready(
        my_linear_ensemble(x, member_w, member_b, reg_w, reg_b,
                           matmul_dtype=jnp.float32, min_pallas_batch=0))
    assert jnp.allclose(out_f32, ref, atol=1e-5, rtol=1e-5)

    # --- larger batch: exercises multi-tile grid, batch padding, transposed
    # output writeback, and the default (non-forced) Pallas dispatch. ------------
    B2 = 1500
    x2 = jax.random.normal(k_x2, (B2, D), dtype=jnp.float32)
    ref2 = _reference(x2, member_w, member_b, reg_w, reg_b)
    out2 = jax.block_until_ready(
        my_linear_ensemble(x2, member_w, member_b, reg_w, reg_b))
    assert out2.shape == (B2, OUT)
    assert jnp.allclose(out2, ref2, atol=2e-2, rtol=2e-2), (
        f"max abs err {jnp.max(jnp.abs(out2 - ref2))}")

    print("KERNEL_OK")
</pallas_src>

<mosaic_0001>
module attributes {stable_mosaic.version = 11 : i64} {
  func.func @_ensemble_kernel(%arg0: i32, %arg1: memref<8x32xf32, #tpu.memory_space<vmem>>, %arg2: memref<128x32xbf16, #tpu.memory_space<vmem>>, %arg3: memref<1x128xf32, #tpu.memory_space<vmem>>, %arg4: memref<8x128xf32, #tpu.memory_space<vmem>>, %arg5: memref<8x1xf32, #tpu.memory_space<vmem>>, %arg6: memref<8x8xf32, #tpu.memory_space<vmem>>) attributes {dimension_semantics = [#tpu.dimension_semantics<parallel>], iteration_bounds = array<i64: 1>, scalar_prefetch = 0 : i64, scratch_operands = 0 : i64, tpu.core_type = #tpu.core_type<tc>, window_params = [{transform_indices = @transform_0, window_bounds = array<i64: 8, 32>}, {pipeline_mode = #tpu.pipeline_mode<synchronous>, transform_indices = @transform_1, window_bounds = array<i64: 128, 32>}, {pipeline_mode = #tpu.pipeline_mode<synchronous>, transform_indices = @transform_2, window_bounds = array<i64: 1, 128>}, {pipeline_mode = #tpu.pipeline_mode<synchronous>, transform_indices = @transform_3, window_bounds = array<i64: 8, 128>}, {pipeline_mode = #tpu.pipeline_mode<synchronous>, transform_indices = @transform_4, window_bounds = array<i64: 8, 1>}, {transform_indices = @transform_5, window_bounds = array<i64: 8, 8>}]} {
    %c0 = arith.constant 0 : index
    %c0_0 = arith.constant 0 : index
    %0 = vector.load %arg1[%c0, %c0_0] : memref<8x32xf32, #tpu.memory_space<vmem>>, vector<8x32xf32>
    %1 = arith.truncf %0 : vector<8x32xf32> to vector<8x32xbf16>
    %c0_1 = arith.constant 0 : index
    %c0_2 = arith.constant 0 : index
    %2 = vector.load %arg2[%c0_1, %c0_2] : memref<128x32xbf16, #tpu.memory_space<vmem>>, vector<128x32xbf16>
    %cst = arith.constant dense<0.000000e+00> : vector<8x128xf32>
    %3 = tpu.matmul %1, %2, %cst {dimension_numbers = #tpu.dot_dimension_numbers<[1], [1], [0], [0], [0, 0, 1, 0], [], []>} : vector<8x32xbf16>, vector<128x32xbf16>, vector<8x128xf32> -> vector<8x128xf32>
    %c0_3 = arith.constant 0 : index
    %c0_4 = arith.constant 0 : index
    %4 = vector.load %arg3[%c0_3, %c0_4] : memref<1x128xf32, #tpu.memory_space<vmem>>, vector<1x128xf32>
    %5 = vector.broadcast %4 : vector<1x128xf32> to vector<8x128xf32>
    %6 = arith.addf %3, %5 : vector<8x128xf32>
    %cst_5 = arith.constant 0.000000e+00 : f32
    %7 = vector.broadcast %cst_5 : f32 to vector<8x128xf32>
    %8 = arith.maximumf %6, %7 : vector<8x128xf32>
    %c0_6 = arith.constant 0 : index
    %c0_7 = arith.constant 0 : index
    %9 = vector.load %arg4[%c0_6, %c0_7] : memref<8x128xf32, #tpu.memory_space<vmem>>, vector<8x128xf32>
    %cst_8 = arith.constant dense<0.000000e+00> : vector<8x8xf32>
    %10 = tpu.matmul %9, %8, %cst_8 {dimension_numbers = #tpu.dot_dimension_numbers<[1], [1], [0], [0], [0, 0, 1, 0], [], []>} : vector<8x128xf32>, vector<8x128xf32>, vector<8x8xf32> -> vector<8x8xf32>
    %c0_9 = arith.constant 0 : index
    %c0_10 = arith.constant 0 : index
    %11 = vector.load %arg5[%c0_9, %c0_10] : memref<8x1xf32, #tpu.memory_space<vmem>>, vector<8x1xf32>
    %12 = vector.broadcast %11 : vector<8x1xf32> to vector<8x8xf32>
    %13 = arith.addf %10, %12 : vector<8x8xf32>
    %c0_11 = arith.constant 0 : index
    %c0_12 = arith.constant 0 : index
    %14 = vector.load %arg6[%c0_11, %c0_12] : memref<8x8xf32, #tpu.memory_space<vmem>>, vector<8x8xf32>
    tpu.vector_store %arg6[%c0_11, %c0_12], %13 {strides = array<i32>} : memref<8x8xf32, #tpu.memory_space<vmem>>, vector<8x8xf32>,
    return
  }
  func.func @transform_0(%arg0: i32) -> (i32, i32) {
    %c0_i32 = arith.constant 0 : i32
    %c0_i32_0 = arith.constant 0 : i32
    return %arg0, %c0_i32 : i32, i32
  }
  func.func @transform_1(%arg0: i32) -> (i32, i32) {
    %c0_i32 = arith.constant 0 : i32
    %c0_i32_0 = arith.constant 0 : i32
    %c0_i32_1 = arith.constant 0 : i32
    return %c0_i32, %c0_i32_0 : i32, i32
  }
  func.func @transform_2(%arg0: i32) -> (i32, i32) {
    %c0_i32 = arith.constant 0 : i32
    %c0_i32_0 = arith.constant 0 : i32
    %c0_i32_1 = arith.constant 0 : i32
    return %c0_i32, %c0_i32_0 : i32, i32
  }
  func.func @transform_3(%arg0: i32) -> (i32, i32) {
    %c0_i32 = arith.constant 0 : i32
    %c0_i32_0 = arith.constant 0 : i32
    %c0_i32_1 = arith.constant 0 : i32
    return %c0_i32, %c0_i32_0 : i32, i32
  }
  func.func @transform_4(%arg0: i32) -> (i32, i32) {
    %c0_i32 = arith.constant 0 : i32
    %c0_i32_0 = arith.constant 0 : i32
    %c0_i32_1 = arith.constant 0 : i32
    return %c0_i32, %c0_i32_0 : i32, i32
  }
  func.func @transform_5(%arg0: i32) -> (i32, i32) {
    %c0_i32 = arith.constant 0 : i32
    %c0_i32_0 = arith.constant 0 : i32
    return %c0_i32, %arg0 : i32, i32
  }
}

</mosaic_0001>

<bundles_post_ra>
// kernel: my_linear_ensemble.1
= control target key start
LH: loop header
LB: loop body
LE: loop exit
PB: predicated region body
PF: predicated region fallthrough
CT: control target
= control target key end

     0   :  { %vm86_vm0 = vcmask 261120   ;;  %v296_v0 = vmov 0.0   ;;  %vm297_vm1 = vmmov 0   ;;  %v298_v19 = vmov 0   ;;  %s377_s1 = inlined_call_operand.vmem [shape: bf16[128,32], index: 1, kind: input, shape index: {}]   ;;  %s378_s0 = inlined_call_operand.vmem [shape: f32[8,32], index: 0, kind: input, shape index: {}]   ;;  %s379_s4 = inlined_call_operand.vmem [shape: f32[8,1], index: 4, kind: input, shape index: {}]   ;;  %s380_s2 = inlined_call_operand.vmem [shape: f32[1,128], index: 2, kind: input, shape index: {}]   ;;  %s381_s3 = inlined_call_operand.vmem [shape: f32[8,128], index: 3, kind: input, shape index: {}]   ;;  %s382_s5 = inlined_call_operand.vmem [shape: f32[8,8], index: 5, kind: output, shape index: {}]  }
   0x1   :  { %259 = vmatprep.subr.bf16.mxu0 %v296_v0  ;;  %v288_v1 = vld [vmem:[%s377_s1 + $0x38] sm:$0xff]   ;;  %275 = vmatprep.mubr.msk.bf16.mxu0 %vm297_vm1, %v296_v0  ;;  %v289_v3 = vld [vmem:[%s377_s1 + $0x30] sm:$0xff]   ;;  %v290_v5 = vld [vmem:[%s377_s1 + $0x28] sm:$0xff]   ;;  %vm232_vm2 = vcmask 64512  }
   0x2   :  { %279 = vmatprep.subr.mxu1 %v296_v0  ;;  %281 = vmatprep.mubr.msk.f32.mxu1 %vm297_vm1, %v296_v0  ;;  %v112_v2 = vsel %vm86_vm0, %v288_v1, 0  ;;  %v109_v4 = vsel %vm86_vm0, %v289_v3, 0  ;;  %v106_v6 = vsel %vm86_vm0, %v290_v5, 0  ;;  %v291_v7 = vld [vmem:[%s377_s1 + $0x20] sm:$0xff]   ;;  %v292_v9 = vld [vmem:[%s377_s1 + $0x18] sm:$0xff]   ;;  %v293_v11 = vld [vmem:[%s377_s1 + $0x10] sm:$0xff]  }
   0x3   :  { %260 = vmatpush3.bf16.xpose.msra.mxu0 %v112_v2  ;;  %v103_v8 = vsel %vm86_vm0, %v291_v7, 0  ;;  %v100_v10 = vsel %vm86_vm0, %v292_v9, 0  ;;  %v97_v12 = vsel %vm86_vm0, %v293_v11, 0  ;;  %v294_v13 = vld [vmem:[%s377_s1 + $0x8] sm:$0xff]   ;;  %v295_v15 = vld [vmem:[%s377_s1] sm:$0xff]   ;;  %287 = vset.pattern.permute.xlu0 %v298_v19 }
   0x4   :  { %261 = vmatprep.subr.bf16.mxu0 %v296_v0  ;;  %v94_v14 = vsel %vm86_vm0, %v294_v13, 0  ;;  %v91_v16 = vsel %vm86_vm0, %v295_v15, 0  ;;  %v21_v17 = vld [vmem:[%s378_s0] sm:$0xff] }
   0x5   :  { %v22_v18 = vpack.c.bf16 %v21_v17, %v21_v17  ;;  %v156_v20 = vld [vmem:[%s379_s4] sm:$0xff] }
   0x6   :  { %159 = vperm.xlu0 %287, %v156_v20   ;;  %v238_v21 = vld [vmem:[%s380_s2] ss:$0 sm:$0xff] }
   0x7   :  { %v155_v27 = vld [vmem:[%s381_s3] sm:$0xff] }
   0xb   :  { %262 = vmatpush3.bf16.xpose.msra.mxu0 %v109_v4 }
   0xc   :  { %263 = vmatprep.subr.bf16.mxu0 %v296_v0 }
  0x13   :  { %264 = vmatpush3.bf16.xpose.msra.mxu0 %v106_v6 }
  0x14   :  { %265 = vmatprep.subr.bf16.mxu0 %v296_v0 }
  0x1b   :  { %266 = vmatpush3.bf16.xpose.msra.mxu0 %v103_v8 }
  0x1c   :  { %267 = vmatprep.subr.bf16.mxu0 %v296_v0 }
  0x23   :  { %268 = vmatpush3.bf16.xpose.msra.mxu0 %v100_v10 }
  0x24   :  { %269 = vmatprep.subr.bf16.mxu0 %v296_v0 }
  0x2b   :  { %270 = vmatpush3.bf16.xpose.msra.mxu0 %v97_v12 }
  0x2c   :  { %271 = vmatprep.subr.bf16.mxu0 %v296_v0 }
  0x33   :  { %272 = vmatpush3.bf16.xpose.msra.mxu0 %v94_v14 }
  0x34   :  { %273 = vmatprep.subr.bf16.mxu0 %v296_v0 }
  0x3b   :  { %274 = vmatpush3.bf16.xpose.msra.mxu0 %v91_v16 }
  0x42   :  { %276 = vmatmul.mubr.msk.bf16.vlgmr.msra.gmra.mxu0 %vm86_vm0, %v22_v18 }
  0x81   :  { %v160_v29 = vpop.permute.xlu0 %159 }
 0x102   :  { %v148_v22 = vpop.f32.mrf.mxu0 }
 0x103   :  { %v149_v23 = vadd.f32 %v238_v21, %v148_v22 }
 0x104   :  { %v277_v24 = vpop.f32.mrf.mxu0 }
 0x105   :  { %v154_v25 = vmax.f32 %v149_v23, 0.0 }
 0x106   :  { %v151_v26 = vpop.f32.mrf.mxu0 }
 0x107   :  { %280 = vmatpush3.xpose.msra.mxu1 %v154_v25 }
 0x108   :  { %v278_v28 = vpop.f32.mrf.mxu0 }
 0x10a   :  { %282 = vmatmul.mubr.f32.vlgmr.msra.gmra.mxu1 %v155_v27 }
 0x1ca   :  { %v228_v30 = vpop.f32.mrf.mxu1 }
 0x1cb   :  { %v229_v31 = vadd.f32 %v228_v30, %v160_v29 }
 0x1cc   :  { %v283_v32 = vpop.f32.mrf.mxu1 }
 0x1cd   :  { %233 = vst.msk [vmem:[%s382_s5] sm:$0xff] %vm232_vm2, %v229_v31 }

</bundles_post_ra>
